<compile_context>
chip_gen: v7x
topology: tpu7x:2x2x1
jax: 0.10.0
libtpu: 0.0.40
codegen_flags: <defaults>
</compile_context>

<pallas_src>
import math

import numpy as np
import jax
import jax.numpy as jnp
from jax.experimental import pallas as pl
from jax.experimental.pallas import tpu as pltpu

_EPS = 1e-5
_NEG_SLOPE = 0.2
_OUT_PAD = 128  # lane-dense output width; the real scalar lives in column 0


def _vmem_spec():
    return pl.BlockSpec(memory_space=pltpu.MemorySpace.VMEM)


def _elementwise_bf16_ok():
    """bf16 VALU exists on v6e / v7x; v5e (and older) must keep the f32 apply path."""
    try:
        kind = jax.devices()[0].device_kind.lower()
    except Exception:
        return False
    return any(tag in kind for tag in ("v6", "v7", "7x", "trillium"))


def _make_fused_kernel(block_cs, out_pad, use_bf16_apply):
    """Ref order: x, [W_conv, A] * num_blocks, W_last, affine, out.

    `affine` is a single (1, total) f32 row laid out as
    [gamma_0 | beta_0 | gamma_1 | beta_1 | ... | bias_last(padded to out_pad)];
    all offsets are multiples of 128 for the given config, so the static slices
    stay lane-aligned.
    """
    num_blocks = len(block_cs)

    def kernel(*refs):
        x_ref = refs[0]
        w_last_ref = refs[1 + 2 * num_blocks]
        aff_ref = refs[2 + 2 * num_blocks]
        o_ref = refs[-1]

        y = x_ref[...]  # bf16 (N, Cin*H*W)
        off = 0
        for i in range(num_blocks):
            w_ref = refs[1 + 2 * i]
            a_ref = refs[2 + 2 * i]
            cs = block_cs[i]

            # Conv as one lane-dense matmul: bf16 operands, f32 MXU accumulate.
            y = jnp.dot(y, w_ref[...], preferred_element_type=jnp.float32)  # (N, cs) f32

            # Training-mode BatchNorm2d, one-pass stats.  s1/s2 stacked into a
            # single (2, cs) @ (cs, cs) matmul (A has the 1/(N*S) scale baked in).
            s1 = jnp.sum(y, axis=0, keepdims=True)           # (1, cs)
            s2 = jnp.sum(y * y, axis=0, keepdims=True)       # (1, cs)
            stats = jnp.dot(jnp.concatenate([s1, s2], axis=0), a_ref[...],
                            preferred_element_type=jnp.float32)            # (2, cs)
            mean = stats[0:1, :]
            var = jnp.maximum(stats[1:2, :] - mean * mean, 0.0)  # clamp cancellation
            inv = jax.lax.rsqrt(var + _EPS)

            gamma = aff_ref[:, off:off + cs]
            beta = aff_ref[:, off + cs:off + 2 * cs]
            off += 2 * cs

            # Fold BN into scale/shift, then a single mul+add per element.
            scale = inv * gamma
            shift = beta - mean * scale
            if use_bf16_apply:
                yb = y.astype(jnp.bfloat16)
                yb = yb * scale.astype(jnp.bfloat16) + shift.astype(jnp.bfloat16)
                y = jnp.maximum(yb, _NEG_SLOPE * yb)          # LeakyReLU, stays bf16
            else:
                yf = y * scale + shift
                yf = jnp.maximum(yf, _NEG_SLOPE * yf)
                y = yf.astype(jnp.bfloat16)

        bias = aff_ref[:, off:off + out_pad]
        o_ref[...] = jnp.dot(y, w_last_ref[...],
                             preferred_element_type=jnp.float32) + bias

    return kernel


def _conv_to_dense(w, H, W, stride, pad):
    """PyTorch conv weight (Cout,Cin,KH,KW) -> dense (Cin*H*W, Cout*OH*OW) operator.

    Row index is cin*H*W + h*W + w (NCHW flattening of the input); column index
    is cout*OH*OW + oh*OW + ow.  Stride / zero-padding are baked in, so the conv
    becomes a single matmul inside the kernel.
    """
    cout, cin, KH, KW = w.shape
    OH = (H + 2 * pad - KH) // stride + 1
    OW = (W + 2 * pad - KW) // stride + 1
    sel = np.zeros((KH, KW, H * W, OH * OW), np.float32)
    for kh in range(KH):
        for kw in range(KW):
            for oh in range(OH):
                ih = oh * stride - pad + kh
                if ih < 0 or ih >= H:
                    continue
                for ow in range(OW):
                    iw = ow * stride - pad + kw
                    if iw < 0 or iw >= W:
                        continue
                    sel[kh, kw, ih * W + iw, oh * OW + ow] = 1.0
    dense = jnp.einsum("xyio,cdxy->dico", jnp.asarray(sel), w.astype(jnp.float32))
    return dense.reshape(cin * H * W, cout * OH * OW), OH, OW


def _bn_avg_matrix(channels, spatial, batch):
    """Block-diag (C*S, C*S): rowsum @ A = per-channel mean broadcast back to columns."""
    a = np.kron(np.eye(channels, dtype=np.float32),
                np.ones((spatial, spatial), np.float32)) / float(batch * spatial)
    return jnp.asarray(a)


def init_params(key, feature_maps, image_channels, size):
    """Deterministic synthetic init matching the module's __init__ shapes."""
    num_layers = int(math.log2(size)) - 2
    num_features = feature_maps // 2 ** (num_layers - 1)
    chans = [(image_channels, num_features)]
    c = num_features
    for _ in range(num_layers - 1):
        chans.append((c, c * 2))
        c *= 2
    assert c == feature_maps
    keys = jax.random.split(key, len(chans) + 1)
    blocks = []
    for (ci, co), k in zip(chans, keys[:-1]):
        kw_key, kb_key = jax.random.split(k)
        blocks.append(
            dict(
                w=jax.random.normal(kw_key, (co, ci, 3, 3), jnp.float32) * 0.1,
                b=jax.random.normal(kb_key, (co,), jnp.float32) * 0.1,
                gamma=jnp.ones((co,), jnp.float32),   # BatchNorm2d default init
                beta=jnp.zeros((co,), jnp.float32),
            )
        )
    kw_key, kb_key = jax.random.split(keys[-1])
    last = dict(
        w=jax.random.normal(kw_key, (1, feature_maps, 4, 4), jnp.float32) * 0.1,
        b=jax.random.normal(kb_key, (1,), jnp.float32) * 0.1,
    )
    return blocks, last


def dcgan_discriminator_forward(x_nchw, blocks, last, idx=0.0):
    """version < 3 forward: self.disc(x).view(B, 1). `idx` is unused there.

    Stack real+fake / several microbatches along the batch dim of `x_nchw` to
    amortize the fixed launch + weight-DMA cost of the single fused call.
    """
    del idx  # only used by the version >= 3 progressive-growing path
    N, C, H, W = x_nchw.shape
    x = x_nchw.reshape(N, C * H * W).astype(jnp.bfloat16)  # NCHW flatten == (cin,h,w) order

    # ---- trace-time preparation of dense per-layer operators (constants under jit) ----
    operands = [x]
    affine_pieces = []
    block_cs = []
    flops = 0
    transcendentals = 0
    h, w = H, W
    for blk in blocks:
        co = blk["w"].shape[0]
        dense, oh, ow = _conv_to_dense(blk["w"], h, w, stride=2, pad=1)
        spatial = oh * ow
        cs = co * spatial
        block_cs.append(cs)
        # Conv bias dropped: exactly cancelled by the BatchNorm mean subtraction.
        operands.append(dense.astype(jnp.bfloat16))
        operands.append(_bn_avg_matrix(co, spatial, N))
        affine_pieces.append(jnp.repeat(blk["gamma"].astype(jnp.float32), spatial))
        affine_pieces.append(jnp.repeat(blk["beta"].astype(jnp.float32), spatial))
        flops += 2 * N * dense.shape[0] * cs + 4 * cs * cs + 6 * N * cs
        transcendentals += cs
        h, w = oh, ow

    dense_last, oh, ow = _conv_to_dense(last["w"], h, w, stride=1, pad=0)
    assert (oh, ow) == (1, 1)
    # Pad the (K, 1) final weight to (K, 128) so the output store is a full-lane vst.
    dense_last = jnp.pad(dense_last, ((0, 0), (0, _OUT_PAD - dense_last.shape[1])))
    operands.append(dense_last.astype(jnp.bfloat16))
    affine_pieces.append(
        jnp.pad(last["b"].astype(jnp.float32), (0, _OUT_PAD - last["b"].shape[0])))
    # Single packed row for all per-channel / bias constants (one DMA instead of five).
    affine = jnp.concatenate(affine_pieces).reshape(1, -1)
    operands.append(affine)
    flops += 2 * N * dense_last.shape[0] * _OUT_PAD

    operand_bytes = sum(int(o.size) * o.dtype.itemsize for o in operands)
    out_bytes = N * _OUT_PAD * 4
    bytes_accessed = operand_bytes + out_bytes

    # Raise the scoped VMEM limit (v5e defaults to 16 MiB) with headroom for larger N,
    # while staying well under v7x's 64 MiB physical per-core VMEM.
    vmem_limit = int(min(60 * 2 ** 20, max(32 * 2 ** 20, 4 * (operand_bytes + out_bytes))))

    kernel = _make_fused_kernel(tuple(block_cs), _OUT_PAD, _elementwise_bf16_ok())

    out = pl.pallas_call(
        kernel,
        out_shape=jax.ShapeDtypeStruct((N, _OUT_PAD), jnp.float32),
        in_specs=[_vmem_spec() for _ in operands],
        out_specs=_vmem_spec(),
        compiler_params=pltpu.CompilerParams(vmem_limit_bytes=vmem_limit),
        cost_estimate=pl.CostEstimate(
            flops=int(flops),
            transcendentals=int(transcendentals),
            bytes_accessed=int(bytes_accessed),
        ),
    )(*operands)
    return out[:, :1]


# TODO(synk): version >= 3 progressive-growing path (weight_formula blending,
# Python-side random.random() logging, core.modules.miniBatchStdDev) depends on
# an external `core.modules` package and host RNG; only the version < 3 path is
# implemented here.

if __name__ == "__main__":
    key = jax.random.PRNGKey(0)
    B, C, SIZE, FEATURE_MAPS = 2, 4, 16, 8
    xkey, pkey = jax.random.split(key)
    x = jax.random.normal(xkey, (B, C, SIZE, SIZE), jnp.float32)
    blocks, last = init_params(pkey, FEATURE_MAPS, C, SIZE)

    fwd = jax.jit(lambda inp: dcgan_discriminator_forward(inp, blocks, last))
    out = jax.block_until_ready(fwd(x))
    assert out.shape == (B, 1) and out.dtype == jnp.float32
    print("KERNEL_OK")
</pallas_src>

<mosaic_0001>
module attributes {stable_mosaic.version = 11 : i64} {
  func.func @kernel(%arg0: memref<2x1024xbf16, #tpu.memory_space<vmem>>, %arg1: memref<1024x256xbf16, #tpu.memory_space<vmem>>, %arg2: memref<256x256xf32, #tpu.memory_space<vmem>>, %arg3: memref<256x128xbf16, #tpu.memory_space<vmem>>, %arg4: memref<128x128xf32, #tpu.memory_space<vmem>>, %arg5: memref<128x128xbf16, #tpu.memory_space<vmem>>, %arg6: memref<1x896xf32, #tpu.memory_space<vmem>>, %arg7: memref<2x128xf32, #tpu.memory_space<vmem>>) attributes {dimension_semantics = [], scalar_prefetch = 0 : i64, scratch_operands = 0 : i64, tpu.core_type = #tpu.core_type<tc>} {
    %c0 = arith.constant 0 : index
    %c0_0 = arith.constant 0 : index
    %0 = vector.load %arg0[%c0, %c0_0] : memref<2x1024xbf16, #tpu.memory_space<vmem>>, vector<2x1024xbf16>
    %c0_1 = arith.constant 0 : index
    %c0_2 = arith.constant 0 : index
    %1 = vector.load %arg1[%c0_1, %c0_2] : memref<1024x256xbf16, #tpu.memory_space<vmem>>, vector<1024x256xbf16>
    %cst = arith.constant dense<0.000000e+00> : vector<2x256xf32>
    %2 = tpu.matmul %0, %1, %cst {dimension_numbers = #tpu.dot_dimension_numbers<[1], [0], [0], [1], [0, 0, 1, 1], [], []>} : vector<2x1024xbf16>, vector<1024x256xbf16>, vector<2x256xf32> -> vector<2x256xf32>
    %cst_3 = arith.constant dense<0.000000e+00> : vector<256xf32>
    %3 = vector.multi_reduction <add>, %2, %cst_3 [0] : vector<2x256xf32> to vector<256xf32>
    %4 = vector.shape_cast %3 : vector<256xf32> to vector<1x256xf32>
    %5 = arith.mulf %2, %2 : vector<2x256xf32>
    %cst_4 = arith.constant dense<0.000000e+00> : vector<256xf32>
    %6 = vector.multi_reduction <add>, %5, %cst_4 [0] : vector<2x256xf32> to vector<256xf32>
    %7 = vector.shape_cast %6 : vector<256xf32> to vector<1x256xf32>
    %8 = tpu.concatenate %4, %7 in 0 : vector<1x256xf32>, vector<1x256xf32> -> vector<2x256xf32>
    %c0_5 = arith.constant 0 : index
    %c0_6 = arith.constant 0 : index
    %9 = vector.load %arg2[%c0_5, %c0_6] : memref<256x256xf32, #tpu.memory_space<vmem>>, vector<256x256xf32>
    %cst_7 = arith.constant dense<0.000000e+00> : vector<2x256xf32>
    %10 = tpu.matmul %8, %9, %cst_7 {dimension_numbers = #tpu.dot_dimension_numbers<[1], [0], [0], [1], [0, 0, 1, 1], [], []>} : vector<2x256xf32>, vector<256x256xf32>, vector<2x256xf32> -> vector<2x256xf32>
    %11 = vector.extract_strided_slice %10 {offsets = [0, 0], sizes = [1, 256], strides = [1, 1]} : vector<2x256xf32> to vector<1x256xf32>
    %12 = vector.extract_strided_slice %10 {offsets = [1, 0], sizes = [1, 256], strides = [1, 1]} : vector<2x256xf32> to vector<1x256xf32>
    %13 = arith.mulf %11, %11 : vector<1x256xf32>
    %14 = arith.subf %12, %13 : vector<1x256xf32>
    %cst_8 = arith.constant 0.000000e+00 : f32
    %15 = vector.broadcast %cst_8 : f32 to vector<1x256xf32>
    %16 = arith.maximumf %14, %15 : vector<1x256xf32>
    %cst_9 = arith.constant 9.99999974E-6 : f32
    %17 = vector.broadcast %cst_9 : f32 to vector<1x256xf32>
    %18 = arith.addf %16, %17 : vector<1x256xf32>
    %19 = math.rsqrt %18 : vector<1x256xf32>
    %c0_10 = arith.constant 0 : index
    %c0_11 = arith.constant 0 : index
    %20 = vector.load %arg6[%c0_10, %c0_11] : memref<1x896xf32, #tpu.memory_space<vmem>>, vector<1x256xf32>
    %c0_12 = arith.constant 0 : index
    %c256 = arith.constant 256 : index
    %21 = vector.load %arg6[%c0_12, %c256] : memref<1x896xf32, #tpu.memory_space<vmem>>, vector<1x256xf32>
    %22 = arith.mulf %19, %20 : vector<1x256xf32>
    %23 = arith.mulf %11, %22 : vector<1x256xf32>
    %24 = arith.subf %21, %23 : vector<1x256xf32>
    %25 = vector.broadcast %22 : vector<1x256xf32> to vector<2x256xf32>
    %26 = arith.mulf %2, %25 : vector<2x256xf32>
    %27 = vector.broadcast %24 : vector<1x256xf32> to vector<2x256xf32>
    %28 = arith.addf %26, %27 : vector<2x256xf32>
    %cst_13 = arith.constant 2.000000e-01 : f32
    %29 = vector.broadcast %cst_13 : f32 to vector<2x256xf32>
    %30 = arith.mulf %29, %28 : vector<2x256xf32>
    %31 = arith.maximumf %28, %30 : vector<2x256xf32>
    %32 = arith.truncf %31 : vector<2x256xf32> to vector<2x256xbf16>
    %c0_14 = arith.constant 0 : index
    %c0_15 = arith.constant 0 : index
    %33 = vector.load %arg3[%c0_14, %c0_15] : memref<256x128xbf16, #tpu.memory_space<vmem>>, vector<256x128xbf16>
    %cst_16 = arith.constant dense<0.000000e+00> : vector<2x128xf32>
    %34 = tpu.matmul %32, %33, %cst_16 {dimension_numbers = #tpu.dot_dimension_numbers<[1], [0], [0], [1], [0, 0, 1, 1], [], []>} : vector<2x256xbf16>, vector<256x128xbf16>, vector<2x128xf32> -> vector<2x128xf32>
    %cst_17 = arith.constant dense<0.000000e+00> : vector<128xf32>
    %35 = vector.multi_reduction <add>, %34, %cst_17 [0] : vector<2x128xf32> to vector<128xf32>
    %36 = vector.shape_cast %35 : vector<128xf32> to vector<1x128xf32>
    %37 = arith.mulf %34, %34 : vector<2x128xf32>
    %cst_18 = arith.constant dense<0.000000e+00> : vector<128xf32>
    %38 = vector.multi_reduction <add>, %37, %cst_18 [0] : vector<2x128xf32> to vector<128xf32>
    %39 = vector.shape_cast %38 : vector<128xf32> to vector<1x128xf32>
    %40 = tpu.concatenate %36, %39 in 0 : vector<1x128xf32>, vector<1x128xf32> -> vector<2x128xf32>
    %c0_19 = arith.constant 0 : index
    %c0_20 = arith.constant 0 : index
    %41 = vector.load %arg4[%c0_19, %c0_20] : memref<128x128xf32, #tpu.memory_space<vmem>>, vector<128x128xf32>
    %cst_21 = arith.constant dense<0.000000e+00> : vector<2x128xf32>
    %42 = tpu.matmul %40, %41, %cst_21 {dimension_numbers = #tpu.dot_dimension_numbers<[1], [0], [0], [1], [0, 0, 1, 1], [], []>} : vector<2x128xf32>, vector<128x128xf32>, vector<2x128xf32> -> vector<2x128xf32>
    %43 = vector.extract_strided_slice %42 {offsets = [0, 0], sizes = [1, 128], strides = [1, 1]} : vector<2x128xf32> to vector<1x128xf32>
    %44 = vector.extract_strided_slice %42 {offsets = [1, 0], sizes = [1, 128], strides = [1, 1]} : vector<2x128xf32> to vector<1x128xf32>
    %45 = arith.mulf %43, %43 : vector<1x128xf32>
    %46 = arith.subf %44, %45 : vector<1x128xf32>
    %cst_22 = arith.constant 0.000000e+00 : f32
    %47 = vector.broadcast %cst_22 : f32 to vector<1x128xf32>
    %48 = arith.maximumf %46, %47 : vector<1x128xf32>
    %cst_23 = arith.constant 9.99999974E-6 : f32
    %49 = vector.broadcast %cst_23 : f32 to vector<1x128xf32>
    %50 = arith.addf %48, %49 : vector<1x128xf32>
    %51 = math.rsqrt %50 : vector<1x128xf32>
    %c0_24 = arith.constant 0 : index
    %c512 = arith.constant 512 : index
    %52 = vector.load %arg6[%c0_24, %c512] : memref<1x896xf32, #tpu.memory_space<vmem>>, vector<1x128xf32>
    %c0_25 = arith.constant 0 : index
    %c640 = arith.constant 640 : index
    %53 = vector.load %arg6[%c0_25, %c640] : memref<1x896xf32, #tpu.memory_space<vmem>>, vector<1x128xf32>
    %54 = arith.mulf %51, %52 : vector<1x128xf32>
    %55 = arith.mulf %43, %54 : vector<1x128xf32>
    %56 = arith.subf %53, %55 : vector<1x128xf32>
    %57 = vector.broadcast %54 : vector<1x128xf32> to vector<2x128xf32>
    %58 = arith.mulf %34, %57 : vector<2x128xf32>
    %59 = vector.broadcast %56 : vector<1x128xf32> to vector<2x128xf32>
    %60 = arith.addf %58, %59 : vector<2x128xf32>
    %cst_26 = arith.constant 2.000000e-01 : f32
    %61 = vector.broadcast %cst_26 : f32 to vector<2x128xf32>
    %62 = arith.mulf %61, %60 : vector<2x128xf32>
    %63 = arith.maximumf %60, %62 : vector<2x128xf32>
    %64 = arith.truncf %63 : vector<2x128xf32> to vector<2x128xbf16>
    %c0_27 = arith.constant 0 : index
    %c768 = arith.constant 768 : index
    %65 = vector.load %arg6[%c0_27, %c768] : memref<1x896xf32, #tpu.memory_space<vmem>>, vector<1x128xf32>
    %c0_28 = arith.constant 0 : index
    %c0_29 = arith.constant 0 : index
    %66 = vector.load %arg5[%c0_28, %c0_29] : memref<128x128xbf16, #tpu.memory_space<vmem>>, vector<128x128xbf16>
    %cst_30 = arith.constant dense<0.000000e+00> : vector<2x128xf32>
    %67 = tpu.matmul %64, %66, %cst_30 {dimension_numbers = #tpu.dot_dimension_numbers<[1], [0], [0], [1], [0, 0, 1, 1], [], []>} : vector<2x128xbf16>, vector<128x128xbf16>, vector<2x128xf32> -> vector<2x128xf32>
    %68 = vector.broadcast %65 : vector<1x128xf32> to vector<2x128xf32>
    %69 = arith.addf %67, %68 : vector<2x128xf32>
    %c0_31 = arith.constant 0 : index
    %c0_32 = arith.constant 0 : index
    %70 = vector.load %arg7[%c0_31, %c0_32] : memref<2x128xf32, #tpu.memory_space<vmem>>, vector<2x128xf32>
    tpu.vector_store %arg7[%c0_31, %c0_32], %69 {strides = array<i32>} : memref<2x128xf32, #tpu.memory_space<vmem>>, vector<2x128xf32>,
    return
  }
}

</mosaic_0001>

<bundles_post_ra>
// kernel: _lambda_.1
= control target key start
LH: loop header
LB: loop body
LE: loop exit
PB: predicated region body
PF: predicated region fallthrough
CT: control target
= control target key end

     0   :  { %v2279_v7 = vmov 1966171168   ;;  %v161_v9 = vlaneseq  ;;  %vm1018_vm0 = vcmask 1041408   ;;  %vm1049_vm1 = vcmask 1040384   ;;  %s3116_s1 = inlined_call_operand.vmem [shape: bf16[1024,256], index: 1, kind: input, shape index: {}]   ;;  %s3117_s0 = inlined_call_operand.vmem [shape: bf16[2,1024], index: 0, kind: input, shape index: {}]   ;;  %s3118_s2 = inlined_call_operand.vmem [shape: f32[256,256], index: 2, kind: input, shape index: {}]   ;;  %s3119_s3 = inlined_call_operand.vmem [shape: bf16[256,128], index: 3, kind: input, shape index: {}]   ;;  %s3120_s4 = inlined_call_operand.vmem [shape: f32[128,128], index: 4, kind: input, shape index: {}]   ;;  %s3121_s6 = inlined_call_operand.vmem [shape: f32[1,896], index: 6, kind: input, shape index: {}]   ;;  %s3122_s5 = inlined_call_operand.vmem [shape: bf16[128,128], index: 5, kind: input, shape index: {}]   ;;  %s3123_s7 = inlined_call_operand.vmem [shape: f32[2,128], index: 7, kind: output, shape index: {}]  }
   0x1   :  { %v2056_v0 = vld [vmem:[%s3116_s1 + $0x104] ss:$8 sps:$4 sm:$0xff]   ;;  %v2058_v1 = vld [vmem:[%s3116_s1 + $0x100] ss:$8 sps:$4 sm:$0xff]   ;;  %v2059_v2 = vld [vmem:[%s3116_s1 + $0x114] ss:$8 sps:$4 sm:$0xff]   ;;  %v159_v8 = vunpack.c.l.s4 %v2279_v7 }
   0x2   :  { %895 = vmatprep.subr.bf16.mxu0 %v2056_v0  ;;  %v2061_v3 = vld [vmem:[%s3116_s1 + $0x110] ss:$8 sps:$4 sm:$0xff]   ;;  %v2062_v4 = vld [vmem:[%s3116_s1 + $0x124] ss:$8 sps:$4 sm:$0xff]   ;;  %v2064_v5 = vld [vmem:[%s3116_s1 + $0x120] ss:$8 sps:$4 sm:$0xff]  }
   0x3   :  { %896 = vmatpush1.bf16.msra.mxu0 %v2058_v1  ;;  %v2065_v6 = vld [vmem:[%s3116_s1 + $0x134] ss:$8 sps:$4 sm:$0xff]   ;;  %v2067_v10 = vld [vmem:[%s3116_s1 + $0x130] ss:$8 sps:$4 sm:$0xff]   ;;  %v2068_v11 = vld [vmem:[%s3116_s1 + $0x144] ss:$8 sps:$4 sm:$0xff]   ;;  %v160_v12 = vunpack.c.0.s8 %v159_v8 }
   0x4   :  { %897 = vmatprep.subr.bf16.mxu0 %v2059_v2  ;;  %v2350_v13 = vshrl.u32 %v161_v9, 7  ;;  %v2070_v14 = vld [vmem:[%s3116_s1 + $0x140] ss:$8 sps:$4 sm:$0xff]   ;;  %v2071_v15 = vld [vmem:[%s3116_s1 + $0x154] ss:$8 sps:$4 sm:$0xff]   ;;  %vm2281_vm2 = vmmov 0  }
   0x5   :  { %v2073_v17 = vld [vmem:[%s3116_s1 + $0x150] ss:$8 sps:$4 sm:$0xff]   ;;  %v2074_v18 = vld [vmem:[%s3116_s1 + $0x164] ss:$8 sps:$4 sm:$0xff]   ;;  %v2076_v21 = vld [vmem:[%s3116_s1 + $0x160] ss:$8 sps:$4 sm:$0xff]  }
   0x6   :  { %v2359_v16 = vsub.s32 %v160_v12, %v2350_v13  ;;  %v27_v19 = vld [vmem:[%s3117_s0] sm:$0xff]  ;;  %v2077_v22 = vld [vmem:[%s3116_s1 + $0x174] ss:$8 sps:$4 sm:$0xff]   ;;  %v2079_v25 = vld [vmem:[%s3116_s1 + $0x170] ss:$8 sps:$4 sm:$0xff]  }
   0x7   :  { %898 = vmatpush1.bf16.msra.mxu0 %v2061_v3  ;;  %v2080_v26 = vld [vmem:[%s3116_s1 + $0x184] ss:$8 sps:$4 sm:$0xff]   ;;  %v2082_v28 = vld [vmem:[%s3116_s1 + $0x180] ss:$8 sps:$4 sm:$0xff]   ;;  %v2083_v29 = vld [vmem:[%s3116_s1 + $0x194] ss:$8 sps:$4 sm:$0xff]   ;;  %v157_v45 = vcombine.high %v27_v19, %v27_v19 }
   0x8   :  { %899 = vmatprep.subr.bf16.mxu0 %v2062_v4  ;;  %v164_v20 = vrot.slane %v27_v19, %v2359_v16  ;;  %v2085_v30 = vld [vmem:[%s3116_s1 + $0x190] ss:$8 sps:$4 sm:$0xff]   ;;  %v2086_v31 = vld [vmem:[%s3116_s1 + $0x1a4] ss:$8 sps:$4 sm:$0xff]   ;;  %v2088_v32 = vld [vmem:[%s3116_s1 + $0x1a0] ss:$8 sps:$4 sm:$0xff]  }
   0x9   :  { %v2089_v33 = vld [vmem:[%s3116_s1 + $0x1b4] ss:$8 sps:$4 sm:$0xff]   ;;  %v2091_v34 = vld [vmem:[%s3116_s1 + $0x1b0] ss:$8 sps:$4 sm:$0xff]   ;;  %v2092_v35 = vld [vmem:[%s3116_s1 + $0x1c4] ss:$8 sps:$4 sm:$0xff]   ;;  %v2448_v50 = vrot.slane %v157_v45, %v2359_v16 }
   0xa   :  { %v172_v23 = vcombine.high %v164_v20, %v164_v20  ;;  %v2153_v36 = vld [vmem:[%s3116_s1 + $0x4] ss:$8 sps:$4 sm:$0xff]   ;;  %v2155_v37 = vld [vmem:[%s3116_s1] ss:$8 sps:$4 sm:$0xff]   ;;  %v2159_v38 = vld [vmem:[%s3116_s1 + $0x14] ss:$8 sps:$4 sm:$0xff]   ;;  %v2460_v54 = vrot.slane %v164_v20, %v2359_v16 }
   0xb   :  { %900 = vmatpush1.bf16.msra.mxu0 %v2064_v5  ;;  %854 = vmatprep.subr.bf16.mxu1 %v2153_v36  ;;  %v2161_v39 = vld [vmem:[%s3116_s1 + $0x10] ss:$8 sps:$4 sm:$0xff]   ;;  %v2094_v40 = vld [vmem:[%s3116_s1 + $0x1c0] ss:$8 sps:$4 sm:$0xff]   ;;  %v2095_v41 = vld [vmem:[%s3116_s1 + $0x1d4] ss:$8 sps:$4 sm:$0xff]   ;;  %v173_v56 = vcombine.high %v2448_v50, %v2448_v50 }
   0xc   :  { %901 = vmatprep.subr.bf16.mxu0 %v2065_v6  ;;  %v194_v24 = vrot.slane %v172_v23, %v2359_v16  ;;  %855 = vmatpush1.bf16.msra.mxu1 %v2155_v37  ;;  %v2165_v42 = vld [vmem:[%s3116_s1 + $0x24] ss:$8 sps:$4 sm:$0xff]   ;;  %v2097_v43 = vld [vmem:[%s3116_s1 + $0x1d0] ss:$8 sps:$4 sm:$0xff]   ;;  %v2167_v44 = vld [vmem:[%s3116_s1 + $0x20] ss:$8 sps:$4 sm:$0xff]   ;;  %v202_v60 = vcombine.high %v2460_v54, %v2460_v54 }
   0xd   :  { %856 = vmatprep.subr.bf16.mxu1 %v2159_v38  ;;  %v2171_v46 = vld [vmem:[%s3116_s1 + $0x34] ss:$8 sps:$4 sm:$0xff]   ;;  %v2098_v47 = vld [vmem:[%s3116_s1 + $0x1e4] ss:$8 sps:$4 sm:$0xff]   ;;  %v2100_v48 = vld [vmem:[%s3116_s1 + $0x1e0] ss:$8 sps:$4 sm:$0xff]   ;;  %v2485_v63 = vrot.slane %v173_v56, %v2359_v16 }
   0xe   :  { %v204_v27 = vcombine.high %v194_v24, %v194_v24  ;;  %886 = vmatprep.mubr.bf16.mxu1 %v194_v24  ;;  %v2173_v49 = vld [vmem:[%s3116_s1 + $0x30] ss:$8 sps:$4 sm:$0xff]   ;;  %v2177_v51 = vld [vmem:[%s3116_s1 + $0x44] ss:$8 sps:$4 sm:$0xff]   ;;  %v2101_v52 = vld [vmem:[%s3116_s1 + $0x1f4] ss:$8 sps:$4 sm:$0xff]  }
   0xf   :  { %902 = vmatpush1.bf16.msra.mxu0 %v2067_v10  ;;  %v2103_v53 = vld [vmem:[%s3116_s1 + $0x1f0] ss:$8 sps:$4 sm:$0xff]   ;;  %v2179_v55 = vld [vmem:[%s3116_s1 + $0x40] ss:$8 sps:$4 sm:$0xff]   ;;  %v2183_v57 = vld [vmem:[%s3116_s1 + $0x54] ss:$8 sps:$4 sm:$0xff]  }
  0x10   :  { %903 = vmatprep.subr.bf16.mxu0 %v2068_v11  ;;  %927 = vmatprep.mubr.bf16.mxu0 %v204_v27  ;;  %v2107_v58 = vld [vmem:[%s3116_s1 + $0x204] ss:$8 sps:$4 sm:$0xff]   ;;  %v2105_v59 = vld [vmem:[%s3116_s1 + $0x200] ss:$8 sps:$4 sm:$0xff]   ;;  %v2185_v61 = vld [vmem:[%s3116_s1 + $0x50] ss:$8 sps:$4 sm:$0xff]  }
  0x11   :  { %857 = vmatpush1.bf16.msra.mxu1 %v2161_v39  ;;  %v2110_v62 = vld [vmem:[%s3116_s1 + $0x214] ss:$8 sps:$4 sm:$0xff]   ;;  %v2189_v0 = vld [vmem:[%s3116_s1 + $0x64] ss:$8 sps:$4 sm:$0xff]   ;;  %v2108_v1 = vld [vmem:[%s3116_s1 + $0x210] ss:$8 sps:$4 sm:$0xff]  }
  0x12   :  { %858 = vmatprep.subr.bf16.mxu1 %v2165_v42  ;;  %v2191_v2 = vld [vmem:[%s3116_s1 + $0x60] ss:$8 sps:$4 sm:$0xff]   ;;  %v2195_v3 = vld [vmem:[%s3116_s1 + $0x74] ss:$8 sps:$4 sm:$0xff]   ;;  %v2113_v4 = vld [vmem:[%s3116_s1 + $0x224] ss:$8 sps:$4 sm:$0xff]  }
  0x13   :  { %904 = vmatpush1.bf16.msra.mxu0 %v2070_v14  ;;  %v2111_v5 = vld [vmem:[%s3116_s1 + $0x220] ss:$8 sps:$4 sm:$0xff]   ;;  %v2197_v6 = vld [vmem:[%s3116_s1 + $0x70] ss:$8 sps:$4 sm:$0xff]   ;;  %v2201_v7 = vld [vmem:[%s3116_s1 + $0x84] ss:$8 sps:$4 sm:$0xff]  }
  0x14   :  { %905 = vmatprep.subr.bf16.mxu0 %v2071_v15  ;;  %v2116_v8 = vld [vmem:[%s3116_s1 + $0x234] ss:$8 sps:$4 sm:$0xff]   ;;  %v2114_v9 = vld [vmem:[%s3116_s1 + $0x230] ss:$8 sps:$4 sm:$0xff]   ;;  %v2203_v10 = vld [vmem:[%s3116_s1 + $0x80] ss:$8 sps:$4 sm:$0xff]  }
  0x15   :  { %859 = vmatpush1.bf16.msra.mxu1 %v2167_v44  ;;  %v2207_v11 = vld [vmem:[%s3116_s1 + $0x94] ss:$8 sps:$4 sm:$0xff]   ;;  %v2119_v12 = vld [vmem:[%s3116_s1 + $0x244] ss:$8 sps:$4 sm:$0xff]   ;;  %v2117_v14 = vld [vmem:[%s3116_s1 + $0x240] ss:$8 sps:$4 sm:$0xff]  }
  0x16   :  { %860 = vmatprep.subr.bf16.mxu1 %v2171_v46  ;;  %v2209_v15 = vld [vmem:[%s3116_s1 + $0x90] ss:$8 sps:$4 sm:$0xff]   ;;  %v2215_v20 = vld [vmem:[%s3116_s1 + $0xa0] ss:$8 sps:$4 sm:$0xff]   ;;  %v2243_v37 = vld [vmem:[%s3116_s1 + $0xf4] ss:$8 sps:$4 sm:$0xff]  }
  0x17   :  { %906 = vmatpush1.bf16.msra.mxu0 %v2073_v17  ;;  %v2213_v17 = vld [vmem:[%s3116_s1 + $0xa4] ss:$8 sps:$4 sm:$0xff]   ;;  %v2120_v19 = vld [vmem:[%s3116_s1 + $0x250] ss:$8 sps:$4 sm:$0xff]   ;;  %v2123_v24 = vld [vmem:[%s3116_s1 + $0x260] ss:$8 sps:$4 sm:$0xff]  }
  0x18   :  { %907 = vmatprep.subr.bf16.mxu0 %v2074_v18  ;;  %v2122_v18 = vld [vmem:[%s3116_s1 + $0x254] ss:$8 sps:$4 sm:$0xff]   ;;  %v2221_v23 = vld [vmem:[%s3116_s1 + $0xb0] ss:$8 sps:$4 sm:$0xff]   ;;  %v2227_v27 = vld [vmem:[%s3116_s1 + $0xc0] ss:$8 sps:$4 sm:$0xff]  }
  0x19   :  { %861 = vmatpush1.bf16.msra.mxu1 %v2173_v49  ;;  %v2132_v36 = vld [vmem:[%s3116_s1 + $0x290] ss:$8 sps:$4 sm:$0xff]   ;;  %v2137_v38 = vld [vmem:[%s3116_s1 + $0x2a4] ss:$8 sps:$4 sm:$0xff]   ;;  %v2135_v42 = vld [vmem:[%s3116_s1 + $0x2a0] ss:$8 sps:$4 sm:$0xff]  }
  0x1a   :  { %862 = vmatprep.subr.bf16.mxu1 %v2177_v51  ;;  %v1053_v39 = vld [vmem:[%s3118_s2 + $0x8] sm:$0xff]  ;;  %v1052_v44 = vld [vmem:[%s3118_s2] sm:$0xff]  ;;  %v1054_v45 = vld [vmem:[%s3118_s2 + $0x10] sm:$0xff] }
  0x1b   :  { %908 = vmatpush1.bf16.msra.mxu0 %v2076_v21  ;;  %v2219_v21 = vld [vmem:[%s3116_s1 + $0xb4] ss:$8 sps:$4 sm:$0xff]   ;;  %v1956_v49 = vpack.c.bf16 %v1054_v45, %v1052_v44  ;;  %v2138_v51 = vld [vmem:[%s3116_s1 + $0x2b0] ss:$8 sps:$4 sm:$0xff]   ;;  %v2143_v56 = vld [vmem:[%s3116_s1 + $0x2c4] ss:$8 sps:$4 sm:$0xff]  }
  0x1c   :  { %909 = vmatprep.subr.bf16.mxu0 %v2077_v22  ;;  %v2125_v22 = vld [vmem:[%s3116_s1 + $0x264] ss:$8 sps:$4 sm:$0xff]   ;;  %v2140_v46 = vld [vmem:[%s3116_s1 + $0x2b4] ss:$8 sps:$4 sm:$0xff]  }
  0x1d   :  { %863 = vmatpush1.bf16.msra.mxu1 %v2179_v55  ;;  %v1058_v55 = vld [vmem:[%s3118_s2 + $0x30] sm:$0xff]  ;;  %v1087_v44 = vld [vmem:[%s3118_s2 + $0x118] sm:$0xff] }
  0x1e   :  { %864 = vmatprep.subr.bf16.mxu1 %v2183_v57  ;;  %v1061_v57 = vld [vmem:[%s3118_s2 + $0x48] sm:$0xff] }
  0x1f   :  { %910 = vmatpush1.bf16.msra.mxu0 %v2079_v25  ;;  %v2225_v25 = vld [vmem:[%s3116_s1 + $0xc4] ss:$8 sps:$4 sm:$0xff]  }
  0x20   :  { %911 = vmatprep.subr.bf16.mxu0 %v2080_v26  ;;  %v2128_v26 = vld [vmem:[%s3116_s1 + $0x274] ss:$8 sps:$4 sm:$0xff]  }
  0x21   :  { %865 = vmatpush1.bf16.msra.mxu1 %v2185_v61 }
  0x22   :  { %866 = vmatprep.subr.bf16.mxu1 %v2189_v0  ;;  %v1062_v0 = vld [vmem:[%s3118_s2 + $0x50] sm:$0xff] }
  0x23   :  { %912 = vmatpush1.bf16.msra.mxu0 %v2082_v28  ;;  %v2126_v28 = vld [vmem:[%s3116_s1 + $0x270] ss:$8 sps:$4 sm:$0xff]  }
  0x24   :  { %913 = vmatprep.subr.bf16.mxu0 %v2083_v29  ;;  %v2231_v29 = vld [vmem:[%s3116_s1 + $0xd4] ss:$8 sps:$4 sm:$0xff]  }
  0x25   :  { %867 = vmatpush1.bf16.msra.mxu1 %v2191_v2  ;;  %v1067_v2 = vld [vmem:[%s3118_s2 + $0x78] sm:$0xff] }
  0x26   :  { %868 = vmatprep.subr.bf16.mxu1 %v2195_v3 }
  0x27   :  { %914 = vmatpush1.bf16.msra.mxu0 %v2085_v30  ;;  %v2131_v30 = vld [vmem:[%s3116_s1 + $0x284] ss:$8 sps:$4 sm:$0xff]  }
  0x28   :  { %915 = vmatprep.subr.bf16.mxu0 %v2086_v31  ;;  %v2233_v31 = vld [vmem:[%s3116_s1 + $0xd0] ss:$8 sps:$4 sm:$0xff]  }
  0x29   :  { %869 = vmatpush1.bf16.msra.mxu1 %v2197_v6  ;;  %v1064_v6 = vld [vmem:[%s3118_s2 + $0x60] sm:$0xff] }
  0x2a   :  { %870 = vmatprep.subr.bf16.mxu1 %v2201_v7  ;;  %v1066_v7 = vld [vmem:[%s3118_s2 + $0x70] sm:$0xff] }
  0x2b   :  { %916 = vmatpush1.bf16.msra.mxu0 %v2088_v32  ;;  %v2129_v32 = vld [vmem:[%s3116_s1 + $0x280] ss:$8 sps:$4 sm:$0xff]  }
  0x2c   :  { %917 = vmatprep.subr.bf16.mxu0 %v2089_v33  ;;  %v2237_v33 = vld [vmem:[%s3116_s1 + $0xe4] ss:$8 sps:$4 sm:$0xff]  }
  0x2d   :  { %871 = vmatpush1.bf16.msra.mxu1 %v2203_v10  ;;  %v1071_v10 = vld [vmem:[%s3118_s2 + $0x98] sm:$0xff] }
  0x2e   :  { %872 = vmatprep.subr.bf16.mxu1 %v2207_v11  ;;  %v1968_v11 = vpack.c.bf16 %v1066_v7, %v1064_v6  ;;  %v2204_v6 = vld [vmem:[%s3116_s1 + $0x380] ss:$8 sps:$4 sm:$0xff]   ;;  %v2212_v7 = vld [vmem:[%s3116_s1 + $0x394] ss:$8 sps:$4 sm:$0xff]  }
  0x2f   :  { %918 = vmatpush1.bf16.msra.mxu0 %v2091_v34  ;;  %v2134_v34 = vld [vmem:[%s3116_s1 + $0x294] ss:$8 sps:$4 sm:$0xff]  }
  0x30   :  { %919 = vmatprep.subr.bf16.mxu0 %v2092_v35  ;;  %v2239_v35 = vld [vmem:[%s3116_s1 + $0xe0] ss:$8 sps:$4 sm:$0xff]  }
  0x31   :  { %873 = vmatpush1.bf16.msra.mxu1 %v2209_v15  ;;  %v1068_v15 = vld [vmem:[%s3118_s2 + $0x80] sm:$0xff] }
  0x32   :  { %874 = vmatprep.subr.bf16.mxu1 %v2213_v17  ;;  %v1070_v17 = vld [vmem:[%s3118_s2 + $0x90] sm:$0xff] }
  0x33   :  { %920 = vmatpush1.bf16.msra.mxu0 %v2094_v40  ;;  %v1055_v40 = vld [vmem:[%s3118_s2 + $0x18] sm:$0xff] }
  0x34   :  { %921 = vmatprep.subr.bf16.mxu0 %v2095_v41  ;;  %v2245_v41 = vld [vmem:[%s3116_s1 + $0xf0] ss:$8 sps:$4 sm:$0xff]  }
  0x35   :  { %875 = vmatpush1.bf16.msra.mxu1 %v2215_v20  ;;  %v1075_v20 = vld [vmem:[%s3118_s2 + $0xb8] sm:$0xff] }
  0x36   :  { %876 = vmatprep.subr.bf16.mxu1 %v2219_v21  ;;  %v1972_v21 = vpack.c.bf16 %v1070_v17, %v1068_v15  ;;  %v2228_v15 = vld [vmem:[%s3116_s1 + $0x3c0] ss:$8 sps:$4 sm:$0xff]   ;;  %v2236_v17 = vld [vmem:[%s3116_s1 + $0x3d4] ss:$8 sps:$4 sm:$0xff]  }
  0x37   :  { %922 = vmatpush1.bf16.msra.mxu0 %v2097_v43  ;;  %v1954_v43 = vpack.c.bf16 %v1055_v40, %v1053_v39  ;;  %v1080_v40 = vld [vmem:[%s3118_s2 + $0xe0] sm:$0xff] }
  0x38   :  { %923 = vmatprep.subr.bf16.mxu0 %v2098_v47  ;;  %v1057_v47 = vld [vmem:[%s3118_s2 + $0x28] sm:$0xff] }
  0x39   :  { %877 = vmatpush1.bf16.msra.mxu1 %v2221_v23 }
  0x3a   :  { %878 = vmatprep.subr.bf16.mxu1 %v2225_v25  ;;  %v1074_v25 = vld [vmem:[%s3118_s2 + $0xb0] sm:$0xff] }
  0x3b   :  { %924 = vmatpush1.bf16.msra.mxu0 %v2100_v48  ;;  %v1059_v48 = vld [vmem:[%s3118_s2 + $0x38] sm:$0xff] }
  0x3c   :  { %925 = vmatprep.subr.bf16.mxu0 %v2101_v52  ;;  %v1958_v52 = vpack.c.bf16 %v1059_v48, %v1057_v47  ;;  %v1084_v48 = vld [vmem:[%s3118_s2 + $0x100] sm:$0xff] }
  0x3d   :  { %879 = vmatpush1.bf16.msra.mxu1 %v2227_v27  ;;  %v1077_v27 = vld [vmem:[%s3118_s2 + $0xc8] sm:$0xff] }
  0x3e   :  { %880 = vmatprep.subr.bf16.mxu1 %v2231_v29  ;;  %v2719_v29 = vrot.slane %v2448_v50, %v2359_v16  ;;  %v1078_v50 = vld [vmem:[%s3118_s2 + $0xd0] sm:$0xff] }
  0x3f   :  { %926 = vmatpush1.bf16.msra.mxu0 %v2103_v53  ;;  %v1056_v53 = vld [vmem:[%s3118_s2 + $0x20] sm:$0xff] }
  0x40   :  { %936 = vmatprep.subr.bf16.mxu0 %v2107_v58  ;;  %v1063_v58 = vld [vmem:[%s3118_s2 + $0x58] sm:$0xff] }
  0x41   :  { %881 = vmatpush1.bf16.msra.mxu1 %v2233_v31  ;;  %v1962_v61 = vpack.c.bf16 %v1063_v58, %v1061_v57  ;;  %v2156_v31 = vld [vmem:[%s3116_s1 + $0x300] ss:$8 sps:$4 sm:$0xff]  }
  0x42   :  { %928 = vmatmul.mubr.bf16.vlgmr.msra.gmra.mrb[0].mxu0 %v202_v60  ;;  %882 = vmatprep.subr.bf16.mxu1 %v2237_v33  ;;  %v2141_v60 = vld [vmem:[%s3116_s1 + $0x2c0] ss:$8 sps:$4 sm:$0xff]  }
  0x43   :  { %937 = vmatpush1.bf16.msra.mxu0 %v2105_v59  ;;  %968 = vmatprep.mubr.bf16.mxu0 %v2485_v63  ;;  %v1960_v59 = vpack.c.bf16 %v1058_v55, %v1056_v53  ;;  %v1076_v33 = vld [vmem:[%s3118_s2 + $0xc0] sm:$0xff]  ;;  %v1091_v53 = vld [vmem:[%s3118_s2 + $0x138] sm:$0xff] }
  0x44   :  { %938 = vmatprep.subr.bf16.mxu0 %v2110_v62  ;;  %v1060_v62 = vld [vmem:[%s3118_s2 + $0x40] sm:$0xff] }
  0x45   :  { %883 = vmatpush1.bf16.msra.mxu1 %v2239_v35  ;;  %v1964_v3 = vpack.c.bf16 %v1062_v0, %v1060_v62  ;;  %v1088_v58 = vld [vmem:[%s3118_s2 + $0x120] sm:$0xff]  ;;  %v2188_v0 = vld [vmem:[%s3116_s1 + $0x354] ss:$8 sps:$4 sm:$0xff]  }
  0x46   :  { %884 = vmatprep.subr.bf16.mxu1 %v2243_v37  ;;  %v1980_v37 = vpack.c.bf16 %v1078_v50, %v1076_v33  ;;  %v2180_v62 = vld [vmem:[%s3116_s1 + $0x340] ss:$8 sps:$4 sm:$0xff]   ;;  %v1098_v50 = vld [vmem:[%s3118_s2 + $0x170] sm:$0xff] }
  0x47   :  { %939 = vmatpush1.bf16.msra.mxu0 %v2108_v1  ;;  %v1065_v1 = vld [vmem:[%s3118_s2 + $0x68] sm:$0xff]  ;;  %v1096_v33 = vld [vmem:[%s3118_s2 + $0x160] sm:$0xff] }
  0x48   :  { %940 = vmatprep.subr.bf16.mxu0 %v2113_v4  ;;  %v2144_v4 = vld [vmem:[%s3116_s1 + $0x2d0] ss:$8 sps:$4 sm:$0xff]  }
  0x49   :  { %885 = vmatpush1.bf16.msra.mxu1 %v2245_v41  ;;  %v1082_v41 = vld [vmem:[%s3118_s2 + $0xf0] sm:$0xff] }
  0x4a   :  { %1955 = vmatprep.subr.bf16.mxu1 %v1954_v43  ;;  %v1085_v43 = vld [vmem:[%s3118_s2 + $0x108] sm:$0xff]  ;;  %v1984_v45 = vpack.c.bf16 %v1082_v41, %v1080_v40  ;;  %v1107_v41 = vld [vmem:[%s3118_s2 + $0x1b8] sm:$0xff] }
  0x4b   :  { %941 = vmatpush1.bf16.msra.mxu0 %v2111_v5  ;;  %v1966_v5 = vpack.c.bf16 %v1067_v2, %v1065_v1  ;;  %v1986_v47 = vpack.c.bf16 %v1087_v44, %v1085_v43  ;;  %v2194_v1 = vld [vmem:[%s3116_s1 + $0x364] ss:$8 sps:$4 sm:$0xff]   ;;  %v2192_v2 = vld [vmem:[%s3116_s1 + $0x360] ss:$8 sps:$4 sm:$0xff]   ;;  %v1106_v44 = vld [vmem:[%s3118_s2 + $0x1b0] sm:$0xff] }
  0x4c   :  { %942 = vmatprep.subr.bf16.mxu0 %v2116_v8  ;;  %887 = vmatmul.mubr.bf16.vlgmr.msra.gmra.mrb[0].mxu1 %v2460_v54  ;;  %v2146_v54 = vld [vmem:[%s3116_s1 + $0x2d4] ss:$8 sps:$4 sm:$0xff]   ;;  %v2149_v8 = vld [vmem:[%s3116_s1 + $0x2e4] ss:$8 sps:$4 sm:$0xff]  }
  0x4d   :  { %1957 = vmatpush1.bf16.msra.mxu1 %v1956_v49  ;;  %v1086_v49 = vld [vmem:[%s3118_s2 + $0x110] sm:$0xff]  ;;  %v1105_v40 = vld [vmem:[%s3118_s2 + $0x1a8] sm:$0xff]  ;;  %v1104_v43 = vld [vmem:[%s3118_s2 + $0x1a0] sm:$0xff] }
  0x4e   :  { %1959 = vmatprep.subr.bf16.mxu1 %v1958_v52  ;;  %v1089_v52 = vld [vmem:[%s3118_s2 + $0x128] sm:$0xff]  ;;  %v1988_v55 = vpack.c.bf16 %v1086_v49, %v1084_v48  ;;  %v1108_v49 = vld [vmem:[%s3118_s2 + $0x1c0] sm:$0xff] }
  0x4f   :  { %943 = vmatpush1.bf16.msra.mxu0 %v2114_v9  ;;  %v1069_v9 = vld [vmem:[%s3118_s2 + $0x88] sm:$0xff]  ;;  %v1990_v57 = vpack.c.bf16 %v1091_v53, %v1089_v52 }
  0x50   :  { %944 = vmatprep.subr.bf16.mxu0 %v2119_v12  ;;  %v2147_v12 = vld [vmem:[%s3116_s1 + $0x2e0] ss:$8 sps:$4 sm:$0xff]  }
  0x51   :  { %1961 = vmatpush1.bf16.msra.mxu1 %v1960_v59  ;;  %v1090_v59 = vld [vmem:[%s3118_s2 + $0x130] sm:$0xff]  ;;  %v1113_v52 = vld [vmem:[%s3118_s2 + $0x1e8] sm:$0xff] }
  0x52   :  { %1963 = vmatprep.subr.bf16.mxu1 %v1962_v61  ;;  %v1992_v61 = vpack.c.bf16 %v1090_v59, %v1088_v58 }
  0x53   :  { %945 = vmatpush1.bf16.msra.mxu0 %v2117_v14  ;;  %v1970_v14 = vpack.c.bf16 %v1071_v10, %v1069_v9  ;;  %v2218_v9 = vld [vmem:[%s3116_s1 + $0x3a4] ss:$8 sps:$4 sm:$0xff]   ;;  %v2216_v10 = vld [vmem:[%s3116_s1 + $0x3a0] ss:$8 sps:$4 sm:$0xff]  }
  0x54   :  { %946 = vmatprep.subr.bf16.mxu0 %v2122_v18  ;;  %v2152_v18 = vld [vmem:[%s3116_s1 + $0x2f4] ss:$8 sps:$4 sm:$0xff]  }
  0x55   :  { %1965 = vmatpush1.bf16.msra.mxu1 %v1964_v3  ;;  %v2200_v3 = vld [vmem:[%s3116_s1 + $0x374] ss:$8 sps:$4 sm:$0xff]  }
  0x56   :  { %1967 = vmatprep.subr.bf16.mxu1 %v1966_v5  ;;  %v2206_v5 = vld [vmem:[%s3116_s1 + $0x384] ss:$8 sps:$4 sm:$0xff]  }
  0x57   :  { %947 = vmatpush1.bf16.msra.mxu0 %v2120_v19  ;;  %v1073_v19 = vld [vmem:[%s3118_s2 + $0xa8] sm:$0xff] }
  0x58   :  { %948 = vmatprep.subr.bf16.mxu0 %v2125_v22  ;;  %v2150_v22 = vld [vmem:[%s3116_s1 + $0x2f0] ss:$8 sps:$4 sm:$0xff]   ;;  %v1974_v23 = vpack.c.bf16 %v1075_v20, %v1073_v19  ;;  %v2242_v19 = vld [vmem:[%s3116_s1 + $0x3e4] ss:$8 sps:$4 sm:$0xff]   ;;  %v2240_v20 = vld [vmem:[%s3116_s1 + $0x3e0] ss:$8 sps:$4 sm:$0xff]  }
  0x59   :  { %1969 = vmatpush1.bf16.msra.mxu1 %v1968_v11  ;;  %v2224_v11 = vld [vmem:[%s3116_s1 + $0x3b4] ss:$8 sps:$4 sm:$0xff]  }
  0x5a   :  { %1971 = vmatprep.subr.bf16.mxu1 %v1970_v14  ;;  %v2230_v14 = vld [vmem:[%s3116_s1 + $0x3c4] ss:$8 sps:$4 sm:$0xff]  }
  0x5b   :  { %949 = vmatpush1.bf16.msra.mxu0 %v2123_v24  ;;  %v1072_v24 = vld [vmem:[%s3118_s2 + $0xa0] sm:$0xff] }
  0x5c   :  { %950 = vmatprep.subr.bf16.mxu0 %v2128_v26  ;;  %v2158_v26 = vld [vmem:[%s3116_s1 + $0x304] ss:$8 sps:$4 sm:$0xff]  }
  0x5d   :  { %1973 = vmatpush1.bf16.msra.mxu1 %v1972_v21  ;;  %v2248_v21 = vld [vmem:[%s3116_s1 + $0x3f4] ss:$8 sps:$4 sm:$0xff]  }
  0x5e   :  { %1975 = vmatprep.subr.bf16.mxu1 %v1974_v23  ;;  %v203_v23 = vcombine.high %v2719_v29, %v2719_v29 }
  0x5f   :  { %951 = vmatpush1.bf16.msra.mxu0 %v2126_v28  ;;  %v1079_v28 = vld [vmem:[%s3118_s2 + $0xd8] sm:$0xff] }
  0x60   :  { %952 = vmatprep.subr.bf16.mxu0 %v2131_v30  ;;  %v1976_v30 = vpack.c.bf16 %v1074_v25, %v1072_v24  ;;  %v1978_v35 = vpack.c.bf16 %v1079_v28, %v1077_v27  ;;  %v1093_v24 = vld [vmem:[%s3118_s2 + $0x148] sm:$0xff]  ;;  %v1095_v25 = vld [vmem:[%s3118_s2 + $0x158] sm:$0xff]  ;;  %v1092_v27 = vld [vmem:[%s3118_s2 + $0x140] sm:$0xff] }
  0x61   :  { %v1094_v28 = vld [vmem:[%s3118_s2 + $0x150] sm:$0xff] }
  0x62   :  { %1977 = vmatpush1.bf16.msra.mxu1 %v1976_v30  ;;  %v1097_v30 = vld [vmem:[%s3118_s2 + $0x168] sm:$0xff] }
  0x63   :  { %953 = vmatpush1.bf16.msra.mxu0 %v2129_v32  ;;  %v205_v32 = vcombine.high %v2485_v63, %v2485_v63  ;;  %v1083_v63 = vld [vmem:[%s3118_s2 + $0xf8] sm:$0xff]  ;;  %1979 = vmatprep.subr.bf16.mxu1 %v1978_v35  ;;  %v1101_v35 = vld [vmem:[%s3118_s2 + $0x188] sm:$0xff] }
  0x64   :  { %954 = vmatprep.subr.bf16.mxu0 %v2134_v34  ;;  %v2164_v34 = vld [vmem:[%s3116_s1 + $0x314] ss:$8 sps:$4 sm:$0xff]  }
  0x66   :  { %1981 = vmatpush1.bf16.msra.mxu1 %v1980_v37  ;;  %v1100_v37 = vld [vmem:[%s3118_s2 + $0x180] sm:$0xff] }
  0x67   :  { %955 = vmatpush1.bf16.msra.mxu0 %v2132_v36  ;;  %v1081_v36 = vld [vmem:[%s3118_s2 + $0xe8] sm:$0xff] }
  0x68   :  { %956 = vmatprep.subr.bf16.mxu0 %v2137_v38  ;;  %v2162_v38 = vld [vmem:[%s3116_s1 + $0x310] ss:$8 sps:$4 sm:$0xff]   ;;  %v1982_v39 = vpack.c.bf16 %v1083_v63, %v1081_v36 }
  0x69   :  { %v1103_v36 = vld [vmem:[%s3118_s2 + $0x198] sm:$0xff] }
  0x6a   :  { %1983 = vmatprep.subr.bf16.mxu1 %v1982_v39  ;;  %v2002_v63 = vpack.c.bf16 %v1103_v36, %v1101_v35 }
  0x6b   :  { %957 = vmatpush1.bf16.msra.mxu0 %v2135_v42  ;;  %v2170_v42 = vld [vmem:[%s3116_s1 + $0x324] ss:$8 sps:$4 sm:$0xff]   ;;  %1985 = vmatpush1.bf16.msra.mxu1 %v1984_v45  ;;  %v2008_v45 = vpack.c.bf16 %v1106_v44, %v1104_v43  ;;  %v2254_v43 = vld [vmem:[%s3119_s3 + $0x10] sm:$0xff]   ;;  %v2255_v44 = vld [vmem:[%s3119_s3 + $0x58] sm:$0xff]  }
  0x6c   :  { %958 = vmatprep.subr.bf16.mxu0 %v2140_v46  ;;  %v2168_v46 = vld [vmem:[%s3116_s1 + $0x320] ss:$8 sps:$4 sm:$0xff]   ;;  %1987 = vmatprep.subr.bf16.mxu1 %v1986_v47  ;;  %v1111_v47 = vld [vmem:[%s3118_s2 + $0x1d8] sm:$0xff] }
  0x6f   :  { %959 = vmatpush1.bf16.msra.mxu0 %v2138_v51  ;;  %v2176_v51 = vld [vmem:[%s3116_s1 + $0x334] ss:$8 sps:$4 sm:$0xff]   ;;  %1989 = vmatpush1.bf16.msra.mxu1 %v1988_v55 }
  0x70   :  { %960 = vmatprep.subr.bf16.mxu0 %v2143_v56  ;;  %v2174_v56 = vld [vmem:[%s3116_s1 + $0x330] ss:$8 sps:$4 sm:$0xff]   ;;  %1991 = vmatprep.subr.bf16.mxu1 %v1990_v57 }
  0x71   :  { %v1115_v55 = vld [vmem:[%s3118_s2 + $0x1f8] sm:$0xff]  ;;  %v1114_v57 = vld [vmem:[%s3118_s2 + $0x1f0] sm:$0xff] }
  0x72   :  { %v2014_v58 = vpack.c.bf16 %v1115_v55, %v1113_v52  ;;  %v2262_v52 = vld [vmem:[%s3119_s3 + $0x30] sm:$0xff]   ;;  %v2264_v55 = vld [vmem:[%s3119_s3 + $0x38] sm:$0xff]  }
  0x73   :  { %961 = vmatpush1.bf16.msra.mxu0 %v2141_v60  ;;  %v2182_v60 = vld [vmem:[%s3116_s1 + $0x344] ss:$8 sps:$4 sm:$0xff]   ;;  %1993 = vmatpush1.bf16.msra.mxu1 %v1992_v61 }
  0x74   :  { %962 = vmatprep.subr.bf16.mxu0 %v2146_v54  ;;  %v2186_v54 = vld [vmem:[%s3116_s1 + $0x350] ss:$8 sps:$4 sm:$0xff]  }
  0x77   :  { %963 = vmatpush1.bf16.msra.mxu0 %v2144_v4  ;;  %v2198_v4 = vld [vmem:[%s3116_s1 + $0x370] ss:$8 sps:$4 sm:$0xff]  }
  0x78   :  { %964 = vmatprep.subr.bf16.mxu0 %v2149_v8  ;;  %v2210_v8 = vld [vmem:[%s3116_s1 + $0x390] ss:$8 sps:$4 sm:$0xff]  }
  0x7b   :  { %965 = vmatpush1.bf16.msra.mxu0 %v2147_v12  ;;  %v2222_v12 = vld [vmem:[%s3116_s1 + $0x3b0] ss:$8 sps:$4 sm:$0xff]  }
  0x7c   :  { %966 = vmatprep.subr.bf16.mxu0 %v2152_v18  ;;  %v2234_v18 = vld [vmem:[%s3116_s1 + $0x3d0] ss:$8 sps:$4 sm:$0xff]  }
  0x7f   :  { %967 = vmatpush1.bf16.msra.mxu0 %v2150_v22  ;;  %v2246_v22 = vld [vmem:[%s3116_s1 + $0x3f0] ss:$8 sps:$4 sm:$0xff]  }
  0x80   :  { %977 = vmatprep.subr.bf16.mxu0 %v2158_v26  ;;  %v1994_v26 = vpack.c.bf16 %v1095_v25, %v1093_v24 }
  0x82   :  { %969 = vmatmul.mubr.bf16.vlgmr.msra.gmra.mrb[0].mxu0 %v2719_v29  ;;  %v1996_v29 = vpack.c.bf16 %v1094_v28, %v1092_v27  ;;  %1995 = vmatprep.subr.bf16.mxu1 %v1994_v26 }
  0x83   :  { %978 = vmatpush1.bf16.msra.mxu0 %v2156_v31  ;;  %1009 = vmatprep.mubr.bf16.mxu0 %v205_v32  ;;  %v1099_v31 = vld [vmem:[%s3118_s2 + $0x178] sm:$0xff] }
  0x84   :  { %979 = vmatprep.subr.bf16.mxu0 %v2164_v34  ;;  %1997 = vmatpush1.bf16.msra.mxu1 %v1996_v29  ;;  %v1998_v32 = vpack.c.bf16 %v1099_v31, %v1097_v30  ;;  %v2000_v34 = vpack.c.bf16 %v1098_v50, %v1096_v33 }
  0x86   :  { %1999 = vmatprep.subr.bf16.mxu1 %v1998_v32 }
  0x87   :  { %980 = vmatpush1.bf16.msra.mxu0 %v2162_v38  ;;  %v1102_v38 = vld [vmem:[%s3118_s2 + $0x190] sm:$0xff] }
  0x88   :  { %981 = vmatprep.subr.bf16.mxu0 %v2170_v42  ;;  %2001 = vmatpush1.bf16.msra.mxu1 %v2000_v34  ;;  %v2004_v39 = vpack.c.bf16 %v1102_v38, %v1100_v37  ;;  %v2006_v42 = vpack.c.bf16 %v1107_v41, %v1105_v40  ;;  %v2249_v38 = vld [vmem:[%s3119_s3 + $0x40] sm:$0xff]   ;;  %v2251_v40 = vld [vmem:[%s3119_s3 + $0x48] sm:$0xff]  }
  0x89   :  { %2003 = vmatprep.subr.bf16.mxu1 %v2002_v63  ;;  %v2252_v41 = vld [vmem:[%s3119_s3 + $0x8] sm:$0xff]  }
  0x8b   :  { %982 = vmatpush1.bf16.msra.mxu0 %v2168_v46  ;;  %v1109_v46 = vld [vmem:[%s3118_s2 + $0x1c8] sm:$0xff] }
  0x8c   :  { %983 = vmatprep.subr.bf16.mxu0 %v2176_v51  ;;  %2005 = vmatpush1.bf16.msra.mxu1 %v2004_v39  ;;  %v2010_v48 = vpack.c.bf16 %v1111_v47, %v1109_v46  ;;  %v1110_v51 = vld [vmem:[%s3118_s2 + $0x1d0] sm:$0xff]  ;;  %v2250_v39 = vld [vmem:[%s3119_s3] sm:$0xff]  }
  0x8d   :  { %2007 = vmatprep.subr.bf16.mxu1 %v2006_v42  ;;  %v2012_v53 = vpack.c.bf16 %v1110_v51, %v1108_v49  ;;  %v2253_v42 = vld [vmem:[%s3119_s3 + $0x50] sm:$0xff]   ;;  %v2257_v46 = vld [vmem:[%s3119_s3 + $0x60] sm:$0xff]   ;;  %v2260_v49 = vld [vmem:[%s3119_s3 + $0x28] sm:$0xff]  }
  0x8e   :  { %v2258_v47 = vld [vmem:[%s3119_s3 + $0x20] sm:$0xff]   ;;  %v2261_v51 = vld [vmem:[%s3119_s3 + $0x70] sm:$0xff]  }
  0x8f   :  { %984 = vmatpush1.bf16.msra.mxu0 %v2174_v56  ;;  %v1112_v56 = vld [vmem:[%s3118_s2 + $0x1e0] sm:$0xff] }
  0x90   :  { %985 = vmatprep.subr.bf16.mxu0 %v2182_v60  ;;  %2009 = vmatpush1.bf16.msra.mxu1 %v2008_v45  ;;  %v2016_v59 = vpack.c.bf16 %v1114_v57, %v1112_v56  ;;  %v2256_v45 = vld [vmem:[%s3119_s3 + $0x18] sm:$0xff]   ;;  %v2280_v56 = vmov 0.0|0.0   ;;  %v1458_v57 = vld [vmem:[%s3120_s4] sm:$0xff] }
  0x91   :  { %2011 = vmatprep.subr.bf16.mxu1 %v2010_v48  ;;  %v2259_v48 = vld [vmem:[%s3119_s3 + $0x68] sm:$0xff]  }
  0x93   :  { %986 = vmatpush1.bf16.msra.mxu0 %v2180_v62 }
  0x94   :  { %987 = vmatprep.subr.bf16.mxu0 %v2188_v0  ;;  %2013 = vmatpush1.bf16.msra.mxu1 %v2012_v53  ;;  %v2263_v53 = vld [vmem:[%s3119_s3 + $0x78] sm:$0xff]  }
  0x95   :  { %2015 = vmatprep.subr.bf16.mxu1 %v2014_v58  ;;  %v1459_v58 = vld [vmem:[%s3120_s4 + $0x8] sm:$0xff] }
  0x97   :  { %988 = vmatpush1.bf16.msra.mxu0 %v2186_v54 }
  0x98   :  { %989 = vmatprep.subr.bf16.mxu0 %v2194_v1  ;;  %2017 = vmatpush1.bf16.msra.mxu1 %v2016_v59  ;;  %v1460_v59 = vld [vmem:[%s3120_s4 + $0x10] sm:$0xff] }
  0x99   :  { %1851 = vmatprep.subr.bf16.mxu1 %v2249_v38 }
  0x9b   :  { %990 = vmatpush1.bf16.msra.mxu0 %v2192_v2 }
  0x9c   :  { %991 = vmatprep.subr.bf16.mxu0 %v2200_v3 }
  0x9f   :  { %992 = vmatpush1.bf16.msra.mxu0 %v2198_v4 }
  0xa0   :  { %993 = vmatprep.subr.bf16.mxu0 %v2206_v5 }
  0xa3   :  { %994 = vmatpush1.bf16.msra.mxu0 %v2204_v6 }
  0xa4   :  { %995 = vmatprep.subr.bf16.mxu0 %v2212_v7 }
  0xa7   :  { %996 = vmatpush1.bf16.msra.mxu0 %v2210_v8 }
  0xa8   :  { %997 = vmatprep.subr.bf16.mxu0 %v2218_v9 }
  0xab   :  { %998 = vmatpush1.bf16.msra.mxu0 %v2216_v10 }
  0xac   :  { %999 = vmatprep.subr.bf16.mxu0 %v2224_v11 }
  0xaf   :  { %1000 = vmatpush1.bf16.msra.mxu0 %v2222_v12 }
  0xb0   :  { %1001 = vmatprep.subr.bf16.mxu0 %v2230_v14 }
  0xb3   :  { %1002 = vmatpush1.bf16.msra.mxu0 %v2228_v15 }
  0xb4   :  { %1003 = vmatprep.subr.bf16.mxu0 %v2236_v17 }
  0xb7   :  { %1004 = vmatpush1.bf16.msra.mxu0 %v2234_v18 }
  0xb8   :  { %1005 = vmatprep.subr.bf16.mxu0 %v2242_v19 }
  0xbb   :  { %1006 = vmatpush1.bf16.msra.mxu0 %v2240_v20 }
  0xbc   :  { %1007 = vmatprep.subr.bf16.mxu0 %v2248_v21 }
  0xbf   :  { %1008 = vmatpush1.bf16.msra.mxu0 %v2246_v22 }
  0xc0   :  { %2018 = vmatprep.subr.bf16.mxu0 %v2280_v56 }
  0xc2   :  { %1010 = vmatmul.mubr.bf16.vlgmr.msra.gmra.mrb[0].mxu0 %v203_v23 }
 0x11f   :  { %v888_v60 = vpop.f32.mrb[0].mxu1 }
 0x120   :  { %v890_v61 = vpop.f32.mrb[1].mxu1 }
 0x121   :  { %v892_v62 = vpop.f32.mrb[2].mxu1 }
 0x122   :  { %v893_v0 = vpop.f32.mrb[3].mxu1 }
 0x123   :  { %v1462_v0 = vld [vmem:[%s3120_s4 + $0x20] sm:$0xff] }
 0x195   :  { %v1011_v54 = vpop.f32.mrb[0].mxu0 }
 0x196   :  { %v2933_v1 = vadd.f32 %v1011_v54, %v888_v60  ;;  %v1013_v2 = vpop.f32.mrb[1].mxu0  ;;  %v2019_v60 = vpack.c.bf16 %v1459_v58, %v1458_v57  ;;  %v1463_v54 = vld [vmem:[%s3120_s4 + $0x28] sm:$0xff] }
 0x197   :  { %v2935_v3 = vadd.f32 %v1013_v2, %v890_v61  ;;  %v1015_v4 = vpop.f32.mrb[2].mxu0  ;;  %v1461_v61 = vld [vmem:[%s3120_s4 + $0x18] sm:$0xff]  ;;  %v2025_v2 = vpack.c.bf16 %v1463_v54, %v1462_v0  ;;  %v1471_v57 = vld [vmem:[%s3120_s4 + $0x68] sm:$0xff] }
 0x198   :  { %v1019_v5 = vsel %vm1018_vm0, %v2933_v1, 0.0  ;;  %v1033_v6 = vmul.f32 %v2933_v1, %v2933_v1  ;;  %v1016_v7 = vpop.f32.mrb[3].mxu0  ;;  %2020 = vmatpush3.bf16.msra.mxu0 %v2019_v60  ;;  %v2022_v62 = vpack.c.bf16 %v1461_v61, %v1460_v59  ;;  %v1472_v59 = vld [vmem:[%s3120_s4 + $0x70] sm:$0xff]  ;;  %v1473_v60 = vld [vmem:[%s3120_s4 + $0x78] sm:$0xff]  ;;  %v2282_v61 = vmov 0.0  }
 0x199   :  { %v1020_v8 = vrot.slane %v1019_v5, 4  ;;  %v1026_v9 = vsel %vm1018_vm0, %v2935_v3, 0.0  ;;  %v1034_v10 = vmul.f32 %v2935_v3, %v2935_v3  ;;  %2021 = vmatprep.subr.bf16.mxu0 %v2280_v56  ;;  %1931 = vmatprep.mubr.msk.f32.mxu0 %vm2281_vm2, %v2282_v61 }
 0x19a   :  { %v1035_v11 = vsel %vm1018_vm0, %v1033_v6, 0.0  ;;  %v1027_v12 = vrot.slane %v1026_v9, 4 }
 0x19b   :  { %v1021_v14 = vadd.f32 %v1020_v8, %v1019_v5  ;;  %v1036_v15 = vrot.slane %v1035_v11, 4  ;;  %v1042_v17 = vsel %vm1018_vm0, %v1034_v10, 0.0 }
 0x19c   :  { %v1028_v18 = vadd.f32 %v1027_v12, %v1026_v9  ;;  %v1043_v19 = vrot.slane %v1042_v17, 4  ;;  %2023 = vmatpush3.bf16.msra.mxu0 %v2022_v62  ;;  %v2040_v62 = vpack.c.bf16 %v1473_v60, %v1472_v59 }
 0x19d   :  { %v1022_v20 = vrot.slane %v1021_v14, 2  ;;  %v1037_v21 = vadd.f32 %v1036_v15, %v1035_v11  ;;  %2024 = vmatprep.subr.bf16.mxu0 %v2280_v56 }
 0x19e   :  { %v1029_v22 = vrot.slane %v1028_v18, 2  ;;  %v1044_v23 = vadd.f32 %v1043_v19, %v1042_v17  ;;  %v1203_v19 = vld [vmem:[%s3121_s6] sm:$0x3] }
 0x19f   :  { %v1023_v24 = vadd.f32 %v1022_v20, %v1021_v14  ;;  %v1038_v25 = vrot.slane %v1037_v21, 2  ;;  %v3026_v20 = vsub.s32 1, %v2350_v13 }
 0x1a0   :  { %v1030_v26 = vadd.f32 %v1029_v22, %v1028_v18  ;;  %v1045_v27 = vrot.slane %v1044_v23, 2  ;;  %2026 = vmatpush3.bf16.msra.mxu0 %v2025_v2  ;;  %v3020_v18 = vsub.s32 0, %v2350_v13  ;;  %v1204_v13 = vld [vmem:[%s3121_s6 + $0x2] sm:$0x3] }
 0x1a1   :  { %v1039_v28 = vadd.f32 %v1038_v25, %v1037_v21  ;;  %v1024_v31 = vrot.slane %v1023_v24, 1  ;;  %2027 = vmatprep.subr.bf16.mxu0 %v2280_v56  ;;  %v1213_v22 = vrot.slane %v1203_v19, %v3026_v20 }
 0x1a2   :  { %v1031_v29 = vrot.slane %v1030_v26, 1  ;;  %v1046_v30 = vadd.f32 %v1045_v27, %v1044_v23  ;;  %v1209_v21 = vrot.slane %v1203_v19, %v3020_v18 }
 0x1a3   :  { %v1040_v32 = vrot.slane %v1039_v28, 1  ;;  %v1025_v36 = vadd.f32 %v1024_v31, %v1023_v24 }
 0x1a4   :  { %v1047_v33 = vrot.slane %v1046_v30, 1  ;;  %v1032_v34 = vadd.f32 %v1031_v29, %v1030_v26 }
 0x1a5   :  { %v1041_v50 = vadd.f32 %v1040_v32, %v1039_v28 }
 0x1a6   :  { %v1048_v35 = vadd.f32 %v1047_v33, %v1046_v30 }
 0x1a7   :  { %v1050_v37 = vsel %vm1049_vm1, %v1025_v36, %v1041_v50 }
 0x1a8   :  { %v1051_v63 = vsel %vm1049_vm1, %v1032_v34, %v1048_v35 }
 0x1a9   :  { %1180 = vmatprep.mubr.f32.mxu1 %v1051_v63 }
 0x1aa   :  { %1181 = vmatmul.mubr.f32.vlgmr.msra.gmra.mrb[4].mxu1 %v1050_v37 }
 0x1ab   :  { %1852 = vmatpush3.bf16.msra.mxu1 %v2250_v39 }
 0x1ac   :  { %1853 = vmatprep.subr.bf16.mxu1 %v2251_v40 }
 0x1af   :  { %1854 = vmatpush3.bf16.msra.mxu1 %v2252_v41 }
 0x1b0   :  { %1855 = vmatprep.subr.bf16.mxu1 %v2253_v42 }
 0x1b3   :  { %1856 = vmatpush3.bf16.msra.mxu1 %v2254_v43 }
 0x1b4   :  { %1857 = vmatprep.subr.bf16.mxu1 %v2255_v44 }
 0x1b7   :  { %1858 = vmatpush3.bf16.msra.mxu1 %v2256_v45 }
 0x1b8   :  { %1859 = vmatprep.subr.bf16.mxu1 %v2257_v46 }
 0x1bb   :  { %1860 = vmatpush3.bf16.msra.mxu1 %v2258_v47  ;;  %v1466_v47 = vld [vmem:[%s3120_s4 + $0x40] sm:$0xff] }
 0x1bc   :  { %1861 = vmatprep.subr.bf16.mxu1 %v2259_v48  ;;  %v1467_v48 = vld [vmem:[%s3120_s4 + $0x48] sm:$0xff] }
 0x1bf   :  { %1862 = vmatpush3.bf16.msra.mxu1 %v2260_v49  ;;  %v2031_v49 = vpack.c.bf16 %v1467_v48, %v1466_v47  ;;  %v1842_v48 = vld [vmem:[%s3121_s6 + $0x6] ss:$0 sm:$0xff] }
 0x1c0   :  { %1863 = vmatprep.subr.bf16.mxu1 %v2261_v51  ;;  %v1468_v51 = vld [vmem:[%s3120_s4 + $0x50] sm:$0xff] }
 0x1c3   :  { %1864 = vmatpush3.bf16.msra.mxu1 %v2262_v52  ;;  %v1469_v52 = vld [vmem:[%s3120_s4 + $0x58] sm:$0xff] }
 0x1c4   :  { %1865 = vmatprep.subr.bf16.mxu1 %v2263_v53  ;;  %v2034_v53 = vpack.c.bf16 %v1469_v52, %v1468_v51 }
 0x1c7   :  { %1866 = vmatpush3.bf16.msra.mxu1 %v2264_v55  ;;  %v1470_v55 = vld [vmem:[%s3120_s4 + $0x60] sm:$0xff] }
 0x1c8   :  { %v2037_v58 = vpack.c.bf16 %v1471_v57, %v1470_v55  ;;  %1934 = vmatprep.subr.bf16.mxu1 %v2282_v61 }
 0x27d   :  { %v1182_v4 = vpop.f32.mrb[4].mxu1 }
 0x27e   :  { %v1187_v5 = vmul.f32 %v1182_v4, %v1182_v4  ;;  %v1184_v6 = vpop.f32.mrb[5].mxu1 }
 0x27f   :  { %v1188_v7 = vmul.f32 %v1184_v6, %v1184_v6 }
 0x280   :  { %v1191_v8 = vrot.slane %v1187_v5, 7 }
 0x281   :  { %v1192_v9 = vrot.slane %v1188_v7, 7 }
 0x282   :  { %v1195_v10 = vsub.f32 %v1182_v4, %v1191_v8 }
 0x283   :  { %v1196_v11 = vsub.f32 %v1184_v6, %v1192_v9 }
 0x284   :  { %v1197_v12 = vmax.f32 %v1195_v10, 0.0 }
 0x285   :  { %v1198_v14 = vmax.f32 %v1196_v11, 0.0 }
 0x286   :  { %v1199_v15 = vadd.f32 1e-05, %v1197_v12 }
 0x287   :  { %v1200_v17 = vadd.f32 1e-05, %v1198_v14 }
 0x288   :  { %2273 = vrsqrt.f32 %v1199_v15 }
 0x289   :  { %2275 = vrsqrt.f32 %v1200_v17 }
 0x292   :  { %v2274_v23 = vpop.eup %2273 }
 0x293   :  { %v2276_v24 = vpop.eup %2275  ;;  %v1216_v25 = vmul.f32 %v2274_v23, %v1209_v21 }
 0x294   :  { %v1217_v26 = vmul.f32 %v2276_v24, %v1213_v22 }
 0x295   :  { %v1220_v27 = vrot.slane %v1216_v25, 1  ;;  %v1248_v33 = vrot.slane %v1216_v25, %v3026_v20  ;;  %v2265_v25 = vld [vmem:[%s3122_s5] sm:$0xff]  }
 0x296   :  { %v1221_v28 = vrot.slane %v1217_v26, 1  ;;  %v1252_v34 = vrot.slane %v1217_v26, %v3026_v20  ;;  %v2266_v26 = vld [vmem:[%s3122_s5 + $0x8] sm:$0xff]  }
 0x297   :  { %v1224_v29 = vmul.f32 %v1220_v27, %v1182_v4  ;;  %v1253_v36 = vmul.f32 %v2933_v1, %v1248_v33  ;;  %v1465_v1 = vld [vmem:[%s3120_s4 + $0x38] sm:$0xff]  ;;  %v2267_v27 = vld [vmem:[%s3122_s5 + $0x10] sm:$0xff]  }
 0x298   :  { %v1225_v30 = vmul.f32 %v1221_v28, %v1184_v6  ;;  %v1254_v63 = vmul.f32 %v2935_v3, %v1252_v34  ;;  %v2268_v28 = vld [vmem:[%s3122_s5 + $0x18] sm:$0xff]  }
 0x29a   :  { %v1228_v31 = vcombine.low %v1224_v29, %v1225_v30  ;;  %v2269_v29 = vld [vmem:[%s3122_s5 + $0x20] sm:$0xff]   ;;  %v2270_v30 = vld [vmem:[%s3122_s5 + $0x28] sm:$0xff]  }
 0x29c   :  { %v1235_v32 = vrot.slane %v1228_v31, %v2359_v16  ;;  %v2271_v31 = vld [vmem:[%s3122_s5 + $0x30] sm:$0xff]  }
 0x29e   :  { %v1242_v50 = vrot.slane %v1235_v32, %v2359_v16  ;;  %v1464_v16 = vld [vmem:[%s3120_s4 + $0x30] sm:$0xff]  ;;  %v2272_v32 = vld [vmem:[%s3122_s5 + $0x38] sm:$0xff]  }
 0x29f   :  { %v2028_v3 = vpack.c.bf16 %v1465_v1, %v1464_v16 }
 0x2a0   :  { %v1244_v35 = vsub.f32 %v1204_v13, %v1242_v50 }
 0x2a1   :  { %2029 = vmatpush3.bf16.msra.mxu0 %v2028_v3 }
 0x2a2   :  { %v1263_v37 = vrot.slane %v1244_v35, %v3026_v20  ;;  %v1259_v38 = vrot.slane %v1244_v35, %v3020_v18  ;;  %2030 = vmatprep.subr.bf16.mxu0 %v2280_v56 }
 0x2a4   :  { %v1267_v39 = vadd.f32 %v1263_v37, %v1254_v63  ;;  %v1266_v40 = vadd.f32 %v1259_v38, %v1253_v36  ;;  %v1841_v37 = vld [vmem:[%s3121_s6 + $0x4] ss:$0 sm:$0xff] }
 0x2a5   :  { %2032 = vmatpush3.bf16.msra.mxu0 %v2031_v49 }
 0x2a6   :  { %v1269_v41 = vmul.f32 0.2, %v1267_v39  ;;  %v1268_v42 = vmul.f32 0.2, %v1266_v40  ;;  %2033 = vmatprep.subr.bf16.mxu0 %v2280_v56 }
 0x2a8   :  { %v1271_v43 = vmax.f32 %v1267_v39, %v1269_v41  ;;  %v1270_v44 = vmax.f32 %v1266_v40, %v1268_v42  ;;  %v1553_v41 = vld [vmem:[%s3121_s6 + $0x5] sm:$0x1] }
 0x2a9   :  { %2035 = vmatpush3.bf16.msra.mxu0 %v2034_v53 }
 0x2aa   :  { %v1273_v45 = vpack.c.bf16 %v1271_v43, %v1271_v43  ;;  %v1272_v46 = vpack.c.bf16 %v1270_v44, %v1270_v44  ;;  %2036 = vmatprep.subr.bf16.mxu0 %v2280_v56 }
 0x2ac   :  { %1434 = vmatprep.mubr.bf16.mxu1 %v1273_v45 }
 0x2ad   :  { %1435 = vmatmul.mubr.bf16.vlgmr.msra.gmra.mrb[8].mxu1 %v1272_v46  ;;  %2038 = vmatpush3.bf16.msra.mxu0 %v2037_v58 }
 0x2ae   :  { %1950 = vmatprep.mubr.msk.bf16.mxu1 %vm2281_vm2, %v2282_v61  ;;  %2039 = vmatprep.subr.bf16.mxu0 %v2280_v56 }
 0x2af   :  { %1935 = vmatpush3.bf16.msra.mxu1 %v2265_v25 }
 0x2b0   :  { %1936 = vmatprep.subr.bf16.mxu1 %v2282_v61 }
 0x2b1   :  { %2041 = vmatpush3.bf16.msra.mxu0 %v2040_v62 }
 0x2b3   :  { %1937 = vmatpush3.bf16.msra.mxu1 %v2266_v26 }
 0x2b4   :  { %1938 = vmatprep.subr.bf16.mxu1 %v2282_v61 }
 0x2b7   :  { %1939 = vmatpush3.bf16.msra.mxu1 %v2267_v27 }
 0x2b8   :  { %1940 = vmatprep.subr.bf16.mxu1 %v2282_v61 }
 0x2bb   :  { %1941 = vmatpush3.bf16.msra.mxu1 %v2268_v28 }
 0x2bc   :  { %1942 = vmatprep.subr.bf16.mxu1 %v2282_v61 }
 0x2bf   :  { %1943 = vmatpush3.bf16.msra.mxu1 %v2269_v29 }
 0x2c0   :  { %1944 = vmatprep.subr.bf16.mxu1 %v2282_v61 }
 0x2c3   :  { %1945 = vmatpush3.bf16.msra.mxu1 %v2270_v30 }
 0x2c4   :  { %1946 = vmatprep.subr.bf16.mxu1 %v2282_v61 }
 0x2c7   :  { %1947 = vmatpush3.bf16.msra.mxu1 %v2271_v31 }
 0x2c8   :  { %1948 = vmatprep.subr.bf16.mxu1 %v2282_v61 }
 0x2cb   :  { %1949 = vmatpush3.bf16.msra.mxu1 %v2272_v32 }
 0x380   :  { %v1867_v0 = vpop.f32.mrb[8].mxu1 }
 0x381   :  { %v1868_v54 = vpop.f32.mrb[9].mxu1 }
 0x382   :  { %v1869_v2 = vadd.f32 %v1868_v54, %v1867_v0  ;;  %v1870_v4 = vpop.f32.mrb[10].mxu1 }
 0x383   :  { %v1871_v5 = vpop.f32.mrb[11].mxu1 }
 0x384   :  { %v1442_v6 = vsel %vm1018_vm0, %v1869_v2, 0.0  ;;  %v1449_v7 = vmul.f32 %v1869_v2, %v1869_v2 }
 0x385   :  { %v1443_v8 = vrot.slane %v1442_v6, 4 }
 0x386   :  { %v1450_v9 = vsel %vm1018_vm0, %v1449_v7, 0.0 }
 0x387   :  { %v1444_v10 = vadd.f32 %v1443_v8, %v1442_v6  ;;  %v1451_v11 = vrot.slane %v1450_v9, 4 }
 0x389   :  { %v1445_v12 = vrot.slane %v1444_v10, 2  ;;  %v1452_v14 = vadd.f32 %v1451_v11, %v1450_v9 }
 0x38b   :  { %v1446_v15 = vadd.f32 %v1445_v12, %v1444_v10  ;;  %v1453_v17 = vrot.slane %v1452_v14, 2 }
 0x38d   :  { %v1447_v19 = vrot.slane %v1446_v15, 1  ;;  %v1454_v56 = vadd.f32 %v1453_v17, %v1452_v14 }
 0x38f   :  { %v1455_v21 = vrot.slane %v1454_v56, 1  ;;  %v1448_v22 = vadd.f32 %v1447_v19, %v1446_v15 }
 0x391   :  { %v1456_v23 = vadd.f32 %v1455_v21, %v1454_v56 }
 0x393   :  { %v1457_v24 = vsel %vm1049_vm1, %v1448_v22, %v1456_v23 }
 0x394   :  { %1932 = vmatmul.mubr.f32.vlgmr.msra.gmra.mrb[4].mxu0 %v1457_v24 }
 0x467   :  { %v1540_v13 = vpop.f32.mrb[4].mxu0 }
 0x468   :  { %v1544_v33 = vmul.f32 %v1540_v13, %v1540_v13  ;;  %v1933_v50 = vpop.f32.mrb[5].mxu0 }
 0x46a   :  { %v1546_v34 = vrot.slane %v1544_v33, 7 }
 0x46c   :  { %v1548_v35 = vsub.f32 %v1540_v13, %v1546_v34 }
 0x46e   :  { %v1549_v36 = vmax.f32 %v1548_v35, 0.0 }
 0x470   :  { %v1550_v63 = vadd.f32 1e-05, %v1549_v36 }
 0x472   :  { %2277 = vrsqrt.f32 %v1550_v63 }
 0x47c   :  { %v2278_v38 = vpop.eup %2277 }
 0x47d   :  { %v1560_v39 = vmul.f32 %v2278_v38, %v1841_v37 }
 0x47f   :  { %v1562_v40 = vrot.slane %v1560_v39, 1  ;;  %v1569_v43 = vrot.slane %v1560_v39, %v3026_v20 }
 0x481   :  { %v1564_v42 = vmul.f32 %v1562_v40, %v1540_v13  ;;  %v1570_v45 = vmul.f32 %v1869_v2, %v1569_v43 }
 0x483   :  { %v1565_v44 = vsub.f32 %v1553_v41, %v1564_v42 }
 0x485   :  { %v1575_v46 = vrot.slane %v1565_v44, %v3020_v18 }
 0x487   :  { %v1577_v16 = vadd.f32 %v1575_v46, %v1570_v45 }
 0x489   :  { %v1578_v1 = vmul.f32 0.2, %v1577_v16 }
 0x48b   :  { %v1579_v3 = vmax.f32 %v1577_v16, %v1578_v1 }
 0x48d   :  { %v1580_v47 = vpack.c.bf16 %v1579_v3, %v1579_v3 }
 0x48f   :  { %1951 = vmatmul.mubr.bf16.vlgmr.msra.gmra.mrb[12].mxu1 %v1580_v47 }
 0x562   :  { %v1686_v49 = vpop.f32.mrb[12].mxu1 }
 0x563   :  { %v1687_v51 = vadd.f32 %v1842_v48, %v1686_v49  ;;  %v1952_v52 = vpop.f32.mrb[13].mxu1 }
 0x564   :  { %v1689_v53 = vpop.f32.mrb[14].mxu1 }
 0x565   :  { %1692 = vst [vmem:[%s3123_s7] sm:$0x3] %v1687_v51  ;;  %v1953_v20 = vpop.f32.mrb[15].mxu1 }

</bundles_post_ra>
